<compile_context>
chip_gen: v7x
topology: tpu7x:2x2x1
jax: 0.10.0
libtpu: 0.0.40
codegen_flags: <defaults>
</compile_context>

<pallas_src>
import functools

import jax
import jax.numpy as jnp
from jax.experimental import pallas as pl
from jax.experimental.pallas import tpu as pltpu


_OUT_LANES = 128          # pad the 2-wide out_proj to one full 128-lane tile
_MIB = 1024 * 1024


def _head_kernel(x_ref, w1_ref, b1_ref, w2_ref, b2_ref, o_ref):
    # x_ref : (tb, 2D)    w1_ref: (2D, D)    b1_ref: (1, D)
    # w2_ref: (D, 128)    b2_ref: (1, 128)   o_ref : (tb, 128)
    # TODO(synk): dropout has no Pallas-side effect in eval mode; implemented as identity.
    x = x_ref[...]  # dtype matches w1 (enforced by the wrapper) -> straight into the MXU

    # dense: MXU matmul with f32 accumulation; bias-add + tanh in f32 (EUP slot).
    h = jnp.dot(x, w1_ref[...], preferred_element_type=jnp.float32)
    h = jnp.tanh(h + b1_ref[...].astype(jnp.float32))

    # out_proj: lane-padded to 128 columns -> unmasked stores, clean MXU tile.
    logits = jnp.dot(h.astype(w2_ref.dtype), w2_ref[...],
                     preferred_element_type=jnp.float32)
    o_ref[...] = (logits + b2_ref[...].astype(jnp.float32)).astype(o_ref.dtype)


def prepare_head_params(w_dense, b_dense, w_out, b_out, dtype=jnp.bfloat16):
    """One-time (call OUTSIDE jit, at model init) parameter prep.

    Converts PyTorch (out_features, in_features) layout to MXU-friendly (in, out)
    layout and zero-pads the out_proj to 128 output lanes.  Default dtype is bf16
    (halves the dominant w1 DMA and doubles MXU rate on v6e/v7x); accumulation
    inside the kernel stays f32.  Pass dtype=jnp.float32 for an exact-precision path.
    """
    d_model = w_dense.shape[0]                                   # out features of dense
    w1 = jnp.asarray(w_dense, dtype).T                           # (2D, D)
    b1 = jnp.asarray(b_dense, dtype).reshape(1, d_model)         # (1, D)
    w2 = jnp.zeros((d_model, _OUT_LANES), dtype).at[:, :2].set(
        jnp.asarray(w_out, dtype).T)                             # (D, 128), cols 2.. == 0
    b2 = jnp.zeros((1, _OUT_LANES), dtype).at[0, :2].set(
        jnp.asarray(b_out, dtype))                               # (1, 128)
    return w1, b1, w2, b2


def _round_up(x, m):
    return (x + m - 1) // m * m


def _tpu_vmem_bytes():
    """Trace-time VMEM capacity query; conservative (v7x-sized) fallback."""
    try:
        return int(pltpu.get_tpu_info().vmem_capacity_bytes)
    except Exception:
        return 64 * _MIB


@functools.partial(jax.jit, static_argnames=("block_rows",))
def roberta_classification_head(features, w1, b1, w2, b2, block_rows=1024):
    """features: [B, 2, d_model]; (w1, b1, w2, b2) from prepare_head_params."""
    two_d, d_model = w1.shape
    # x.reshape(-1, x.size(-1) * 2); enforce a single dtype with the params so the
    # first dot never promotes the big weight tile inside the kernel.
    x = features.reshape(-1, two_d).astype(w1.dtype)
    B = x.shape[0]

    vmem_cap = _tpu_vmem_bytes()
    small_vmem = vmem_cap <= 64 * _MIB            # v7x-class: 64 MiB VMEM, 2 TCs/chip

    # Row-tile selection:
    #  * small batches -> one full block (weight-DMA-bound; splitting only adds overhead)
    #  * v7x with B > 512 -> >=2 parallel tiles so both TensorCores run
    #  * large batches -> fat 1024-row tiles to amortize per-step overhead.
    if B <= block_rows:
        tb = B
        if small_vmem and B > 512:
            tb = min(B, _round_up(pl.cdiv(B, 2), 8))
    else:
        tb = block_rows
    grid = (pl.cdiv(B, tb),)

    # Generation-aware VMEM budget: ~96 MiB on v5e/v6e (128 MiB physical),
    # <=56 MiB on v7x (64 MiB physical).
    vmem_limit = (56 * _MIB) if small_vmem else (96 * _MIB)

    out_dtype = w1.dtype
    nbytes = lambda a: a.size * a.dtype.itemsize
    cost = pl.CostEstimate(
        flops=2 * B * two_d * d_model + 2 * B * d_model * _OUT_LANES,
        transcendentals=B * d_model,
        bytes_accessed=(nbytes(x) + nbytes(w1) + nbytes(b1) + nbytes(w2) + nbytes(b2)
                        + B * _OUT_LANES * jnp.dtype(out_dtype).itemsize),
    )

    # Weights/biases have a constant block index -> resident across grid steps; single
    # buffering (Buffered(1)) avoids a dead second VMEM copy of w1.
    resident = pl.Buffered(1)

    out = pl.pallas_call(
        _head_kernel,
        out_shape=jax.ShapeDtypeStruct((B, _OUT_LANES), out_dtype),
        grid_spec=pltpu.PrefetchScalarGridSpec(
            num_scalar_prefetch=0,
            grid=grid,
            in_specs=[
                # Activations: one row-tile per grid step (double-buffered by default).
                pl.BlockSpec((tb, two_d), lambda i: (i, 0)),
                # Resident parameter blocks.
                pl.BlockSpec((two_d, d_model), lambda i: (0, 0), pipeline_mode=resident),
                pl.BlockSpec((1, d_model), lambda i: (0, 0), pipeline_mode=resident),
                pl.BlockSpec((d_model, _OUT_LANES), lambda i: (0, 0), pipeline_mode=resident),
                pl.BlockSpec((1, _OUT_LANES), lambda i: (0, 0), pipeline_mode=resident),
            ],
            out_specs=pl.BlockSpec((tb, _OUT_LANES), lambda i: (i, 0)),
        ),
        compiler_params=pltpu.CompilerParams(
            dimension_semantics=("parallel",),      # batch tiles shard across TCs (v7x)
            vmem_limit_bytes=vmem_limit,
        ),
        cost_estimate=cost,
    )(x, w1, b1, w2, b2)

    return out[:, :2]                               # drop the lane padding


def _reference(features, w_dense, b_dense, w_out, b_out):
    B = features.shape[0]
    x = features.reshape(B, -1)
    h = jnp.tanh(x @ w_dense.T + b_dense)
    return h @ w_out.T + b_out


if __name__ == "__main__":
    key = jax.random.PRNGKey(0)
    d_model = 32
    batch = 8

    k_feat, k_w1, k_b1, k_w2, k_b2 = jax.random.split(key, 5)

    # features: [batch, 2, d_model] — two code embeddings per example.
    features = jax.random.normal(k_feat, (batch, 2, d_model), dtype=jnp.float32)

    # Synthetic parameters in PyTorch Linear layout: (out_features, in_features).
    w_dense = jax.random.normal(k_w1, (d_model, 2 * d_model), dtype=jnp.float32) * 0.02
    b_dense = jax.random.normal(k_b1, (d_model,), dtype=jnp.float32) * 0.02
    w_out = jax.random.normal(k_w2, (2, d_model), dtype=jnp.float32) * 0.02
    b_out = jax.random.normal(k_b2, (2,), dtype=jnp.float32) * 0.02

    ref = _reference(features, w_dense, b_dense, w_out, b_out)

    # --- exact-precision path (f32 params): tight check vs reference ------------------
    w1f, b1f, w2f, b2f = prepare_head_params(w_dense, b_dense, w_out, b_out,
                                             dtype=jnp.float32)
    out_f32 = roberta_classification_head(features, w1f, b1f, w2f, b2f)
    out_f32 = jax.block_until_ready(out_f32)
    assert out_f32.shape == (batch, 2)
    assert jnp.allclose(out_f32.astype(jnp.float32), ref, atol=1e-5, rtol=1e-5), \
        "f32 path mismatch vs reference"

    # --- production path (bf16 params + activations): loose check ---------------------
    w1, b1, w2, b2 = prepare_head_params(w_dense, b_dense, w_out, b_out)   # bf16 default
    out_bf16 = roberta_classification_head(features, w1, b1, w2, b2)
    out_bf16 = jax.block_until_ready(out_bf16)
    assert out_bf16.shape == (batch, 2)
    assert out_bf16.dtype == jnp.bfloat16
    assert jnp.allclose(out_bf16.astype(jnp.float32), ref, atol=2e-2, rtol=2e-2), \
        "bf16 path mismatch vs reference"

    print("KERNEL_OK")
</pallas_src>

<mosaic_0001>
module attributes {stable_mosaic.version = 11 : i64} {
  func.func @_head_kernel(%arg0: i32, %arg1: memref<8x64xf32, #tpu.memory_space<vmem>>, %arg2: memref<64x32xf32, #tpu.memory_space<vmem>>, %arg3: memref<1x32xf32, #tpu.memory_space<vmem>>, %arg4: memref<32x128xf32, #tpu.memory_space<vmem>>, %arg5: memref<1x128xf32, #tpu.memory_space<vmem>>, %arg6: memref<8x128xf32, #tpu.memory_space<vmem>>) attributes {dimension_semantics = [#tpu.dimension_semantics<parallel>], iteration_bounds = array<i64: 1>, scalar_prefetch = 0 : i64, scratch_operands = 0 : i64, tpu.core_type = #tpu.core_type<tc>, window_params = [{transform_indices = @transform_0, window_bounds = array<i64: 8, 64>}, {pipeline_mode = #tpu.pipeline_mode<synchronous>, transform_indices = @transform_1, window_bounds = array<i64: 64, 32>}, {pipeline_mode = #tpu.pipeline_mode<synchronous>, transform_indices = @transform_2, window_bounds = array<i64: 1, 32>}, {pipeline_mode = #tpu.pipeline_mode<synchronous>, transform_indices = @transform_3, window_bounds = array<i64: 32, 128>}, {pipeline_mode = #tpu.pipeline_mode<synchronous>, transform_indices = @transform_4, window_bounds = array<i64: 1, 128>}, {transform_indices = @transform_5, window_bounds = array<i64: 8, 128>}]} {
    %c0 = arith.constant 0 : index
    %c0_0 = arith.constant 0 : index
    %0 = vector.load %arg1[%c0, %c0_0] : memref<8x64xf32, #tpu.memory_space<vmem>>, vector<8x64xf32>
    %c0_1 = arith.constant 0 : index
    %c0_2 = arith.constant 0 : index
    %1 = vector.load %arg2[%c0_1, %c0_2] : memref<64x32xf32, #tpu.memory_space<vmem>>, vector<64x32xf32>
    %cst = arith.constant dense<0.000000e+00> : vector<8x32xf32>
    %2 = tpu.matmul %0, %1, %cst {dimension_numbers = #tpu.dot_dimension_numbers<[1], [0], [0], [1], [0, 0, 1, 1], [], []>} : vector<8x64xf32>, vector<64x32xf32>, vector<8x32xf32> -> vector<8x32xf32>
    %c0_3 = arith.constant 0 : index
    %c0_4 = arith.constant 0 : index
    %3 = vector.load %arg3[%c0_3, %c0_4] : memref<1x32xf32, #tpu.memory_space<vmem>>, vector<1x32xf32>
    %4 = vector.broadcast %3 : vector<1x32xf32> to vector<8x32xf32>
    %5 = arith.addf %2, %4 : vector<8x32xf32>
    %6 = math.tanh %5 : vector<8x32xf32>
    %c0_5 = arith.constant 0 : index
    %c0_6 = arith.constant 0 : index
    %7 = vector.load %arg4[%c0_5, %c0_6] : memref<32x128xf32, #tpu.memory_space<vmem>>, vector<32x128xf32>
    %cst_7 = arith.constant dense<0.000000e+00> : vector<8x128xf32>
    %8 = tpu.matmul %6, %7, %cst_7 {dimension_numbers = #tpu.dot_dimension_numbers<[1], [0], [0], [1], [0, 0, 1, 1], [], []>} : vector<8x32xf32>, vector<32x128xf32>, vector<8x128xf32> -> vector<8x128xf32>
    %c0_8 = arith.constant 0 : index
    %c0_9 = arith.constant 0 : index
    %9 = vector.load %arg5[%c0_8, %c0_9] : memref<1x128xf32, #tpu.memory_space<vmem>>, vector<1x128xf32>
    %10 = vector.broadcast %9 : vector<1x128xf32> to vector<8x128xf32>
    %11 = arith.addf %8, %10 : vector<8x128xf32>
    %c0_10 = arith.constant 0 : index
    %c0_11 = arith.constant 0 : index
    %12 = vector.load %arg6[%c0_10, %c0_11] : memref<8x128xf32, #tpu.memory_space<vmem>>, vector<8x128xf32>
    tpu.vector_store %arg6[%c0_10, %c0_11], %11 {strides = array<i32>} : memref<8x128xf32, #tpu.memory_space<vmem>>, vector<8x128xf32>,
    return
  }
  func.func @transform_0(%arg0: i32) -> (i32, i32) {
    %c0_i32 = arith.constant 0 : i32
    %c0_i32_0 = arith.constant 0 : i32
    return %arg0, %c0_i32 : i32, i32
  }
  func.func @transform_1(%arg0: i32) -> (i32, i32) {
    %c0_i32 = arith.constant 0 : i32
    %c0_i32_0 = arith.constant 0 : i32
    %c0_i32_1 = arith.constant 0 : i32
    return %c0_i32, %c0_i32_0 : i32, i32
  }
  func.func @transform_2(%arg0: i32) -> (i32, i32) {
    %c0_i32 = arith.constant 0 : i32
    %c0_i32_0 = arith.constant 0 : i32
    %c0_i32_1 = arith.constant 0 : i32
    return %c0_i32, %c0_i32_0 : i32, i32
  }
  func.func @transform_3(%arg0: i32) -> (i32, i32) {
    %c0_i32 = arith.constant 0 : i32
    %c0_i32_0 = arith.constant 0 : i32
    %c0_i32_1 = arith.constant 0 : i32
    return %c0_i32, %c0_i32_0 : i32, i32
  }
  func.func @transform_4(%arg0: i32) -> (i32, i32) {
    %c0_i32 = arith.constant 0 : i32
    %c0_i32_0 = arith.constant 0 : i32
    %c0_i32_1 = arith.constant 0 : i32
    return %c0_i32, %c0_i32_0 : i32, i32
  }
  func.func @transform_5(%arg0: i32) -> (i32, i32) {
    %c0_i32 = arith.constant 0 : i32
    %c0_i32_0 = arith.constant 0 : i32
    return %arg0, %c0_i32 : i32, i32
  }
}

</mosaic_0001>

<bundles_post_ra>
// kernel: roberta_classification_head.1
= control target key start
LH: loop header
LB: loop body
LE: loop exit
PB: predicated region body
PF: predicated region fallthrough
CT: control target
= control target key end

     0   :  { %v272_v0 = vmov 0.0|0.0   ;;  %vm273_vm0 = vmmov 0   ;;  %v274_v4 = vmov 0.0   ;;  %vm36_vm1 = vcmask 523264   ;;  %s353_s1 = inlined_call_operand.vmem [shape: f32[64,32], index: 1, kind: input, shape index: {}]   ;;  %s354_s0 = inlined_call_operand.vmem [shape: f32[8,64], index: 0, kind: input, shape index: {}]   ;;  %s355_s3 = inlined_call_operand.vmem [shape: f32[32,128], index: 3, kind: input, shape index: {}]   ;;  %s356_s2 = inlined_call_operand.vmem [shape: f32[1,32], index: 2, kind: input, shape index: {}]   ;;  %s357_s4 = inlined_call_operand.vmem [shape: f32[1,128], index: 4, kind: input, shape index: {}]   ;;  %s358_s5 = inlined_call_operand.vmem [shape: f32[8,128], index: 5, kind: output, shape index: {}]  }
   0x1   :  { %249 = vmatprep.subr.bf16.mxu0 %v272_v0  ;;  %v21_v1 = vld [vmem:[%s353_s1] sm:$0xff]  ;;  %v22_v2 = vld [vmem:[%s353_s1 + $0x8] sm:$0xff]  ;;  %v23_v3 = vld [vmem:[%s353_s1 + $0x10] sm:$0xff]  ;;  %235 = vmatprep.mubr.msk.f32.mxu0 %vm273_vm0, %v274_v4  ;;  %vm122_vm2 = vcmask 261120  }
   0x2   :  { %v250_v5 = vpack.c.bf16 %v22_v2, %v21_v1  ;;  %v24_v6 = vld [vmem:[%s353_s1 + $0x18] sm:$0xff]  ;;  %261 = vmatprep.subr.bf16.mxu1 %v272_v0  ;;  %246 = vmatprep.mubr.msk.f32.mxu1 %vm273_vm0, %v274_v4  ;;  %v25_v8 = vld [vmem:[%s353_s1 + $0x20] sm:$0xff]  ;;  %v26_v9 = vld [vmem:[%s353_s1 + $0x28] sm:$0xff] }
   0x3   :  { %v253_v7 = vpack.c.bf16 %v24_v6, %v23_v3  ;;  %v256_v10 = vpack.c.bf16 %v26_v9, %v25_v8  ;;  %v27_v11 = vld [vmem:[%s353_s1 + $0x30] sm:$0xff]  ;;  %v28_v12 = vld [vmem:[%s353_s1 + $0x38] sm:$0xff]  ;;  %v20_v14 = vld [vmem:[%s354_s0] sm:$0xff] }
   0x4   :  { %251 = vmatpush3.bf16.msra.mxu0 %v250_v5  ;;  %v259_v13 = vpack.c.bf16 %v28_v12, %v27_v11  ;;  %v111_v15 = vld [vmem:[%s355_s3] sm:$0xff]  ;;  %v112_v16 = vld [vmem:[%s355_s3 + $0x8] sm:$0xff]  ;;  %v113_v17 = vld [vmem:[%s355_s3 + $0x10] sm:$0xff] }
   0x5   :  { %252 = vmatprep.subr.bf16.mxu0 %v272_v0  ;;  %v262_v18 = vpack.c.bf16 %v112_v16, %v111_v15  ;;  %v114_v19 = vld [vmem:[%s355_s3 + $0x18] sm:$0xff]  ;;  %v201_v21 = vld [vmem:[%s356_s2] ss:$0 sm:$0xff] }
   0x6   :  { %v265_v20 = vpack.c.bf16 %v114_v19, %v113_v17  ;;  %v203_v26 = vld [vmem:[%s357_s4] ss:$0 sm:$0xff] }
   0x7   :  { %263 = vmatpush3.bf16.msra.mxu1 %v262_v18 }
   0x8   :  { %254 = vmatpush3.bf16.msra.mxu0 %v253_v7  ;;  %264 = vmatprep.subr.bf16.mxu1 %v272_v0 }
   0x9   :  { %255 = vmatprep.subr.bf16.mxu0 %v272_v0 }
   0xb   :  { %266 = vmatpush3.bf16.msra.mxu1 %v265_v20 }
   0xc   :  { %257 = vmatpush3.bf16.msra.mxu0 %v256_v10 }
   0xd   :  { %258 = vmatprep.subr.bf16.mxu0 %v272_v0 }
  0x10   :  { %260 = vmatpush3.bf16.msra.mxu0 %v259_v13 }
  0x13   :  { %236 = vmatmul.mubr.msk.f32.vlgmr.msra.gmra.mrb[0].mxu0 %vm36_vm1, %v20_v14 }
  0xe6   :  { %v106_v22 = vpop.f32.mrb[0].mxu0 }
  0xe7   :  { %v107_v23 = vadd.f32 %v201_v21, %v106_v22  ;;  %v237_v24 = vpop.f32.mrb[1].mxu0 }
  0xe9   :  { %270 = vtanh.f32 %v107_v23 }
  0xf3   :  { %v271_v25 = vpop.eup %270 }
  0xf4   :  { %247 = vmatmul.mubr.msk.f32.vlgmr.msra.gmra.mrb[0].mxu1 %vm122_vm2, %v271_v25 }
 0x1c7   :  { %v192_v27 = vpop.f32.mrb[0].mxu1 }
 0x1c8   :  { %v193_v28 = vadd.f32 %v203_v26, %v192_v27  ;;  %v248_v29 = vpop.f32.mrb[1].mxu1 }
 0x1ca   :  { %196 = vst [vmem:[%s358_s5] sm:$0xff] %v193_v28 }

</bundles_post_ra>
